<compile_context>
chip_gen: v7x
topology: tpu7x:2x2x1
jax: 0.10.0
libtpu: 0.0.40
codegen_flags: <defaults>
</compile_context>

<pallas_src>
import jax
import jax.numpy as jnp
from jax import lax
from jax.experimental import pallas as pl
from jax.experimental.pallas import tpu as pltpu


def _round_up(x, m):
    return ((x + m - 1) // m) * m


def _make_ahd_kernel(n, m, tn, tm, n_tiles_n, n_tiles_m):
    need_row_mask = (n % tn) != 0   # last set1 tile contains padded rows
    need_col_mask = (m % tm) != 0   # last set2 tile contains padded rows
    inv_n = 1.0 / n
    inv_m = 1.0 / m

    def kernel(x_ref, y_ref, out_ref, row_min_ref, col_min_ref, acc_ref):
        i = pl.program_id(0)   # tile index over set1 rows
        j = pl.program_id(1)   # tile index over set2 rows (fast axis)

        # ---- init accumulators that persist across the whole grid ----------
        @pl.when((i == 0) & (j == 0))
        def _():
            col_min_ref[...] = jnp.full(col_min_ref.shape, jnp.inf,
                                        dtype=jnp.float32)
            acc_ref[...] = jnp.zeros(acc_ref.shape, dtype=jnp.float32)

        # Running row-min is per row-block; reset at the start of each i block.
        @pl.when(j == 0)
        def _():
            row_min_ref[...] = jnp.full(row_min_ref.shape, jnp.inf,
                                        dtype=jnp.float32)

        # ---- pairwise squared distances for this (tn, tm) tile -------------
        x = x_ref[...]                       # (tn, d), input dtype
        y = y_ref[...]                       # (tm, d)
        xf = x.astype(jnp.float32)
        yf = y.astype(jnp.float32)

        # ||x||^2 per row -> (tn, 1): lane-axis reduce, natural column layout.
        x_sq = jnp.sum(xf * xf, axis=1, keepdims=True)

        # ||y||^2 per row produced directly in row orientation (1, tm) via a
        # tiny MXU dot with a ones vector (avoids a sublane->lane relayout).
        ones_row = jnp.ones((1, xf.shape[1]), dtype=jnp.float32)
        y_sq = lax.dot_general(ones_row, yf * yf,
                               (((1,), (1,)), ((), ())),
                               preferred_element_type=jnp.float32)   # (1, tm)

        # x @ y.T on the MXU: contract the feature dim of both operands (no
        # explicit transpose).  bf16 inputs stay bf16; accumulate in f32.
        xy = lax.dot_general(x, y, (((1,), (1,)), ((), ())),
                             preferred_element_type=jnp.float32)     # (tn, tm)

        d2 = x_sq + y_sq - 2.0 * xy                                  # (tn, tm)
        inf = jnp.float32(jnp.inf)

        # ---- term_1 path: running min over set2 (columns) ------------------
        if need_col_mask:
            col_ids = j * tm + lax.broadcasted_iota(jnp.int32, (1, tm), 1)
            d2_rows = jnp.where(col_ids < m, d2, inf)
        else:
            d2_rows = d2
        row_min_ref[...] = jnp.minimum(
            row_min_ref[...], jnp.min(d2_rows, axis=1, keepdims=True))

        # ---- term_2 path: running min over set1 (rows) ---------------------
        if need_row_mask:
            row_ids = i * tn + lax.broadcasted_iota(jnp.int32, (tn, 1), 0)
            d2_cols = jnp.where(row_ids < n, d2, inf)
        else:
            d2_cols = d2
        cur_col_min = jnp.min(d2_cols, axis=0, keepdims=True)        # (1, tm)
        c0 = pl.multiple_of(j * tm, tm)
        col_min_ref[:, pl.ds(c0, tm)] = jnp.minimum(
            col_min_ref[:, pl.ds(c0, tm)], cur_col_min)

        # ---- flush term_1 contribution when the row block is complete ------
        @pl.when(j == n_tiles_m - 1)
        def _():
            rm = row_min_ref[...]                                    # (tn, 1)
            if need_row_mask:
                rids = i * tn + lax.broadcasted_iota(jnp.int32, (tn, 1), 0)
                rm = jnp.where(rids < n, rm, 0.0)
            rm = jnp.sqrt(jnp.maximum(rm, 0.0))     # sqrt on only tn values
            acc_ref[...] += jnp.sum(rm, keepdims=True) * inv_n

        # ---- finalize: add term_2, write the scalar exactly once -----------
        @pl.when((i == n_tiles_n - 1) & (j == n_tiles_m - 1))
        def _():
            cm = col_min_ref[...]                                    # (1, m_pad)
            if need_col_mask:
                cids = lax.broadcasted_iota(jnp.int32, cm.shape, 1)
                cm = jnp.where(cids < m, cm, 0.0)
            cm = jnp.sqrt(jnp.maximum(cm, 0.0))     # sqrt on only m_pad values
            out_ref[...] = acc_ref[...] + jnp.sum(cm, keepdims=True) * inv_m

    return kernel


def averaged_hausdorff_loss(set1, set2, *, block_n=512, block_m=512):
    """Pallas-backed Averaged Hausdorff Distance between two 2-D point sets."""
    assert set1.ndim == 2, f"got {set1.ndim}"
    assert set2.ndim == 2, f"got {set2.ndim}"
    assert set1.shape[1] == set2.shape[1], (
        "The points in both sets must have the same number of dimensions, "
        f"got {set1.shape[1]} and {set2.shape[1]}."
    )

    n, d = set1.shape
    m, _ = set2.shape

    # Tile sizes: sublane-aligned (8) rows for set1, lane-aligned (128) rows
    # for set2 so the (tn, tm) distance tile keeps M on the lane axis.
    tn = _round_up(min(block_n, _round_up(n, 8)), 8)
    tm = _round_up(min(block_m, _round_up(m, 128)), 128)
    n_pad = _round_up(n, tn)
    m_pad = _round_up(m, tm)
    grid = (n_pad // tn, m_pad // tm)

    x = set1 if n_pad == n else jnp.pad(set1, ((0, n_pad - n), (0, 0)))
    y = set2 if m_pad == m else jnp.pad(set2, ((0, m_pad - m), (0, 0)))

    kernel = _make_ahd_kernel(n, m, tn, tm, grid[0], grid[1])

    out = pl.pallas_call(
        kernel,
        out_shape=jax.ShapeDtypeStruct((1, 1), jnp.float32),
        grid_spec=pltpu.PrefetchScalarGridSpec(
            num_scalar_prefetch=0,
            grid=grid,
            in_specs=[
                pl.BlockSpec((tn, d), lambda i, j: (i, 0)),   # set1 row tile
                pl.BlockSpec((tm, d), lambda i, j: (j, 0)),   # set2 row tile
            ],
            out_specs=pl.BlockSpec((1, 1), lambda i, j: (0, 0)),
            scratch_shapes=[
                pltpu.VMEM((tn, 1), jnp.float32),     # row-min (current block)
                pltpu.VMEM((1, m_pad), jnp.float32),  # col-min (all blocks)
                pltpu.VMEM((1, 1), jnp.float32),      # term_1 accumulator
            ],
        ),
        # Both grid axes are reduction axes for one of the two terms (shared
        # scratch accumulators), so both must stay sequential ("arbitrary").
        compiler_params=pltpu.CompilerParams(
            dimension_semantics=("arbitrary", "arbitrary")),
    )(x, y)
    return out[0, 0]


def _reference_ahd(set1, set2):
    # Pure-JAX reference mirroring the PyTorch forward, for verification.
    diff = set1[:, None, :] - set2[None, :, :]
    dist = jnp.sqrt(jnp.sum(diff ** 2, axis=-1))
    return jnp.mean(jnp.min(dist, axis=1)) + jnp.mean(jnp.min(dist, axis=0))


if __name__ == "__main__":
    key = jax.random.PRNGKey(0)
    k1, k2, k3, k4 = jax.random.split(key, 4)

    # Case 1: small point sets (single grid tile), default block sizes.
    N, M, D = 16, 24, 32
    set1 = jax.random.normal(k1, (N, D), dtype=jnp.float32)
    set2 = jax.random.normal(k2, (M, D), dtype=jnp.float32)
    res = jax.block_until_ready(averaged_hausdorff_loss(set1, set2))
    ref = jax.block_until_ready(_reference_ahd(set1, set2))
    assert jnp.allclose(res, ref, rtol=1e-4, atol=1e-4), (res, ref)

    # Case 2: multi-tile grid with row/column padding (exercises masking,
    # the accumulator flushes, and the pipelined grid path).
    N2, M2, D2 = 100, 200, 48
    set1b = jax.random.normal(k3, (N2, D2), dtype=jnp.float32)
    set2b = jax.random.normal(k4, (M2, D2), dtype=jnp.float32)
    res2 = jax.block_until_ready(
        averaged_hausdorff_loss(set1b, set2b, block_n=64, block_m=128))
    ref2 = jax.block_until_ready(_reference_ahd(set1b, set2b))
    assert jnp.allclose(res2, ref2, rtol=1e-4, atol=1e-4), (res2, ref2)

    print("KERNEL_OK")
</pallas_src>

<mosaic_0001>
module attributes {stable_mosaic.version = 11 : i64} {
  func.func @kernel(%arg0: i32, %arg1: i32, %arg2: memref<16x32xf32, #tpu.memory_space<vmem>>, %arg3: memref<128x32xf32, #tpu.memory_space<vmem>>, %arg4: memref<1x1xf32, #tpu.memory_space<vmem>>, %arg5: memref<16x1xf32, #tpu.memory_space<vmem>>, %arg6: memref<1x128xf32, #tpu.memory_space<vmem>>, %arg7: memref<1x1xf32, #tpu.memory_space<vmem>>) attributes {dimension_semantics = [#tpu.dimension_semantics<arbitrary>, #tpu.dimension_semantics<arbitrary>], iteration_bounds = array<i64: 1, 1>, scalar_prefetch = 0 : i64, scratch_operands = 3 : i64, tpu.core_type = #tpu.core_type<tc>, window_params = [{transform_indices = @transform_0, window_bounds = array<i64: 16, 32>}, {transform_indices = @transform_1, window_bounds = array<i64: 128, 32>}, {pipeline_mode = #tpu.pipeline_mode<synchronous>, transform_indices = @transform_2, window_bounds = array<i64: 1, 1>}]} {
    %c0_i32 = arith.constant 0 : i32
    %0 = arith.cmpi eq, %arg0, %c0_i32 : i32
    %c0_i32_0 = arith.constant 0 : i32
    %1 = arith.cmpi eq, %arg1, %c0_i32_0 : i32
    %2 = arith.andi %0, %1 : i1
    %3 = arith.extui %2 : i1 to i32
    %c0_i32_1 = arith.constant 0 : i32
    %4 = arith.cmpi ne, %3, %c0_i32_1 : i32
    scf.if %4 {
      %cst_26 = arith.constant 0x7F800000 : f32
      %55 = vector.broadcast %cst_26 : f32 to vector<1x128xf32>
      %c0_27 = arith.constant 0 : index
      %c0_28 = arith.constant 0 : index
      %56 = vector.load %arg6[%c0_27, %c0_28] : memref<1x128xf32, #tpu.memory_space<vmem>>, vector<1x128xf32>
      tpu.vector_store %arg6[%c0_27, %c0_28], %55 {strides = array<i32>} : memref<1x128xf32, #tpu.memory_space<vmem>>, vector<1x128xf32>,
      %cst_29 = arith.constant 0.000000e+00 : f32
      %57 = vector.broadcast %cst_29 : f32 to vector<1x1xf32>
      %c0_30 = arith.constant 0 : index
      %c0_31 = arith.constant 0 : index
      %58 = vector.load %arg7[%c0_30, %c0_31] : memref<1x1xf32, #tpu.memory_space<vmem>>, vector<1x1xf32>
      tpu.vector_store %arg7[%c0_30, %c0_31], %57 {strides = array<i32>} : memref<1x1xf32, #tpu.memory_space<vmem>>, vector<1x1xf32>,
    } else {
    }
    %c0_i32_2 = arith.constant 0 : i32
    %5 = arith.cmpi eq, %arg1, %c0_i32_2 : i32
    %6 = arith.extui %5 : i1 to i32
    %c0_i32_3 = arith.constant 0 : i32
    %7 = arith.cmpi ne, %6, %c0_i32_3 : i32
    scf.if %7 {
      %cst_26 = arith.constant 0x7F800000 : f32
      %55 = vector.broadcast %cst_26 : f32 to vector<16x1xf32>
      %c0_27 = arith.constant 0 : index
      %c0_28 = arith.constant 0 : index
      %56 = vector.load %arg5[%c0_27, %c0_28] : memref<16x1xf32, #tpu.memory_space<vmem>>, vector<16x1xf32>
      tpu.vector_store %arg5[%c0_27, %c0_28], %55 {strides = array<i32>} : memref<16x1xf32, #tpu.memory_space<vmem>>, vector<16x1xf32>,
    } else {
    }
    %c0 = arith.constant 0 : index
    %c0_4 = arith.constant 0 : index
    %8 = vector.load %arg2[%c0, %c0_4] : memref<16x32xf32, #tpu.memory_space<vmem>>, vector<16x32xf32>
    %c0_5 = arith.constant 0 : index
    %c0_6 = arith.constant 0 : index
    %9 = vector.load %arg3[%c0_5, %c0_6] : memref<128x32xf32, #tpu.memory_space<vmem>>, vector<128x32xf32>
    %10 = arith.mulf %8, %8 : vector<16x32xf32>
    %cst = arith.constant dense<0.000000e+00> : vector<16xf32>
    %11 = vector.multi_reduction <add>, %10, %cst [1] : vector<16x32xf32> to vector<16xf32>
    %12 = vector.shape_cast %11 : vector<16xf32> to vector<16x1xf32>
    %cst_7 = arith.constant 1.000000e+00 : f32
    %13 = vector.broadcast %cst_7 : f32 to vector<1x32xf32>
    %14 = arith.mulf %9, %9 : vector<128x32xf32>
    %cst_8 = arith.constant dense<0.000000e+00> : vector<1x128xf32>
    %15 = tpu.matmul %13, %14, %cst_8 {dimension_numbers = #tpu.dot_dimension_numbers<[1], [1], [0], [0], [0, 0, 1, 0], [], []>} : vector<1x32xf32>, vector<128x32xf32>, vector<1x128xf32> -> vector<1x128xf32>
    %cst_9 = arith.constant dense<0.000000e+00> : vector<16x128xf32>
    %16 = tpu.matmul %8, %9, %cst_9 {dimension_numbers = #tpu.dot_dimension_numbers<[1], [1], [0], [0], [0, 0, 1, 0], [], []>} : vector<16x32xf32>, vector<128x32xf32>, vector<16x128xf32> -> vector<16x128xf32>
    %17 = vector.broadcast %12 : vector<16x1xf32> to vector<16x128xf32>
    %18 = vector.broadcast %15 : vector<1x128xf32> to vector<16x128xf32>
    %19 = arith.addf %17, %18 : vector<16x128xf32>
    %cst_10 = arith.constant 2.000000e+00 : f32
    %20 = vector.broadcast %cst_10 : f32 to vector<16x128xf32>
    %21 = arith.mulf %20, %16 : vector<16x128xf32>
    %22 = arith.subf %19, %21 : vector<16x128xf32>
    %c128_i32 = arith.constant 128 : i32
    %23 = arith.muli %arg1, %c128_i32 : i32
    %24 = tpu.iota {dimensions = array<i32: 1>} : vector<1x128xi32>
    %25 = vector.broadcast %23 : i32 to vector<1x128xi32>
    %26 = arith.addi %25, %24 : vector<1x128xi32>
    %c24_i32 = arith.constant 24 : i32
    %27 = vector.broadcast %c24_i32 : i32 to vector<1x128xi32>
    %28 = arith.cmpi slt, %26, %27 : vector<1x128xi32>
    %cst_11 = arith.constant 0x7F800000 : f32
    %29 = vector.shape_cast %28 : vector<1x128xi1> to vector<1x128xi1>
    %30 = vector.broadcast %29 : vector<1x128xi1> to vector<16x128xi1>
    %31 = vector.broadcast %cst_11 : f32 to vector<16x128xf32>
    %32 = arith.select %30, %22, %31 : vector<16x128xi1>, vector<16x128xf32>
    %c0_12 = arith.constant 0 : index
    %c0_13 = arith.constant 0 : index
    %33 = vector.load %arg5[%c0_12, %c0_13] : memref<16x1xf32, #tpu.memory_space<vmem>>, vector<16x1xf32>
    %cst_14 = arith.constant dense<0x7F800000> : vector<16xf32>
    %34 = vector.multi_reduction <minimumf>, %32, %cst_14 [1] : vector<16x128xf32> to vector<16xf32>
    %35 = vector.shape_cast %34 : vector<16xf32> to vector<16x1xf32>
    %36 = arith.minimumf %33, %35 : vector<16x1xf32>
    %c0_15 = arith.constant 0 : index
    %c0_16 = arith.constant 0 : index
    %37 = vector.load %arg5[%c0_15, %c0_16] : memref<16x1xf32, #tpu.memory_space<vmem>>, vector<16x1xf32>
    tpu.vector_store %arg5[%c0_15, %c0_16], %36 {strides = array<i32>} : memref<16x1xf32, #tpu.memory_space<vmem>>, vector<16x1xf32>,
    %cst_17 = arith.constant dense<0x7F800000> : vector<128xf32>
    %38 = vector.multi_reduction <minimumf>, %22, %cst_17 [0] : vector<16x128xf32> to vector<128xf32>
    %39 = vector.shape_cast %38 : vector<128xf32> to vector<1x128xf32>
    %c128_i32_18 = arith.constant 128 : i32
    %40 = arith.muli %arg1, %c128_i32_18 : i32
    %41 = tpu.assume_multiple %40, 128 : i32
    %c0_19 = arith.constant 0 : index
    %42 = arith.index_cast %41 : i32 to index
    %43 = vector.load %arg6[%c0_19, %42] : memref<1x128xf32, #tpu.memory_space<vmem>>, vector<1x128xf32>
    %44 = arith.minimumf %43, %39 : vector<1x128xf32>
    %c0_20 = arith.constant 0 : index
    %45 = arith.index_cast %41 : i32 to index
    %46 = vector.load %arg6[%c0_20, %45] : memref<1x128xf32, #tpu.memory_space<vmem>>, vector<1x128xf32>
    tpu.vector_store %arg6[%c0_20, %45], %44 {strides = array<i32>} : memref<1x128xf32, #tpu.memory_space<vmem>>, vector<1x128xf32>,
    %c0_i32_21 = arith.constant 0 : i32
    %47 = arith.cmpi eq, %arg1, %c0_i32_21 : i32
    %48 = arith.extui %47 : i1 to i32
    %c0_i32_22 = arith.constant 0 : i32
    %49 = arith.cmpi ne, %48, %c0_i32_22 : i32
    scf.if %49 {
      %c0_26 = arith.constant 0 : index
      %c0_27 = arith.constant 0 : index
      %55 = vector.load %arg5[%c0_26, %c0_27] : memref<16x1xf32, #tpu.memory_space<vmem>>, vector<16x1xf32>
      %cst_28 = arith.constant 0.000000e+00 : f32
      %56 = vector.broadcast %cst_28 : f32 to vector<16x1xf32>
      %57 = arith.maximumf %55, %56 : vector<16x1xf32>
      %58 = math.sqrt %57 : vector<16x1xf32>
      %c0_29 = arith.constant 0 : index
      %c0_30 = arith.constant 0 : index
      %59 = vector.load %arg7[%c0_29, %c0_30] : memref<1x1xf32, #tpu.memory_space<vmem>>, vector<1x1xf32>
      %60 = vector.shape_cast %58 : vector<16x1xf32> to vector<1x16x1xf32>
      %cst_31 = arith.constant dense<0.000000e+00> : vector<1xf32>
      %61 = vector.multi_reduction <add>, %60, %cst_31 [1, 2] : vector<1x16x1xf32> to vector<1xf32>
      %62 = vector.shape_cast %61 : vector<1xf32> to vector<1x1x1xf32>
      %63 = vector.extract %62[0, 0, 0] : f32 from vector<1x1x1xf32>
      %64 = vector.broadcast %63 : f32 to vector<1x1xf32>
      %cst_32 = arith.constant 6.250000e-02 : f32
      %65 = vector.broadcast %cst_32 : f32 to vector<1x1xf32>
      %66 = arith.mulf %64, %65 : vector<1x1xf32>
      %67 = arith.addf %59, %66 : vector<1x1xf32>
      %c0_33 = arith.constant 0 : index
      %c0_34 = arith.constant 0 : index
      %68 = vector.load %arg7[%c0_33, %c0_34] : memref<1x1xf32, #tpu.memory_space<vmem>>, vector<1x1xf32>
      tpu.vector_store %arg7[%c0_33, %c0_34], %67 {strides = array<i32>} : memref<1x1xf32, #tpu.memory_space<vmem>>, vector<1x1xf32>,
    } else {
    }
    %c0_i32_23 = arith.constant 0 : i32
    %50 = arith.cmpi eq, %arg0, %c0_i32_23 : i32
    %c0_i32_24 = arith.constant 0 : i32
    %51 = arith.cmpi eq, %arg1, %c0_i32_24 : i32
    %52 = arith.andi %50, %51 : i1
    %53 = arith.extui %52 : i1 to i32
    %c0_i32_25 = arith.constant 0 : i32
    %54 = arith.cmpi ne, %53, %c0_i32_25 : i32
    scf.if %54 {
      %c0_26 = arith.constant 0 : index
      %c0_27 = arith.constant 0 : index
      %55 = vector.load %arg6[%c0_26, %c0_27] : memref<1x128xf32, #tpu.memory_space<vmem>>, vector<1x128xf32>
      %56 = tpu.iota {dimensions = array<i32: 1>} : vector<1x128xi32>
      %c24_i32_28 = arith.constant 24 : i32
      %57 = vector.broadcast %c24_i32_28 : i32 to vector<1x128xi32>
      %58 = arith.cmpi slt, %56, %57 : vector<1x128xi32>
      %cst_29 = arith.constant 0.000000e+00 : f32
      %59 = vector.broadcast %cst_29 : f32 to vector<1x128xf32>
      %60 = arith.select %58, %55, %59 : vector<1x128xi1>, vector<1x128xf32>
      %cst_30 = arith.constant 0.000000e+00 : f32
      %61 = vector.broadcast %cst_30 : f32 to vector<1x128xf32>
      %62 = arith.maximumf %60, %61 : vector<1x128xf32>
      %63 = math.sqrt %62 : vector<1x128xf32>
      %c0_31 = arith.constant 0 : index
      %c0_32 = arith.constant 0 : index
      %64 = vector.load %arg7[%c0_31, %c0_32] : memref<1x1xf32, #tpu.memory_space<vmem>>, vector<1x1xf32>
      %65 = vector.shape_cast %63 : vector<1x128xf32> to vector<1x1x128xf32>
      %cst_33 = arith.constant dense<0.000000e+00> : vector<1xf32>
      %66 = vector.multi_reduction <add>, %65, %cst_33 [1, 2] : vector<1x1x128xf32> to vector<1xf32>
      %67 = vector.shape_cast %66 : vector<1xf32> to vector<1x1x1xf32>
      %68 = vector.extract %67[0, 0, 0] : f32 from vector<1x1x1xf32>
      %69 = vector.broadcast %68 : f32 to vector<1x1xf32>
      %cst_34 = arith.constant 0.0416666679 : f32
      %70 = vector.broadcast %cst_34 : f32 to vector<1x1xf32>
      %71 = arith.mulf %69, %70 : vector<1x1xf32>
      %72 = arith.addf %64, %71 : vector<1x1xf32>
      %c0_35 = arith.constant 0 : index
      %c0_36 = arith.constant 0 : index
      %73 = vector.load %arg4[%c0_35, %c0_36] : memref<1x1xf32, #tpu.memory_space<vmem>>, vector<1x1xf32>
      tpu.vector_store %arg4[%c0_35, %c0_36], %72 {strides = array<i32>} : memref<1x1xf32, #tpu.memory_space<vmem>>, vector<1x1xf32>,
    } else {
    }
    return
  }
  func.func @transform_0(%arg0: i32, %arg1: i32) -> (i32, i32) {
    %c0_i32 = arith.constant 0 : i32
    %c0_i32_0 = arith.constant 0 : i32
    return %arg0, %c0_i32 : i32, i32
  }
  func.func @transform_1(%arg0: i32, %arg1: i32) -> (i32, i32) {
    %c0_i32 = arith.constant 0 : i32
    %c0_i32_0 = arith.constant 0 : i32
    return %arg1, %c0_i32 : i32, i32
  }
  func.func @transform_2(%arg0: i32, %arg1: i32) -> (i32, i32) {
    %c0_i32 = arith.constant 0 : i32
    %c0_i32_0 = arith.constant 0 : i32
    %c0_i32_1 = arith.constant 0 : i32
    return %c0_i32, %c0_i32_0 : i32, i32
  }
}

</mosaic_0001>

<bundles_post_ra>
// kernel: tpu_custom_call.1
= control target key start
LH: loop header
LB: loop body
LE: loop exit
PB: predicated region body
PF: predicated region fallthrough
CT: control target
= control target key end

     0   :  { %vm47_vm0 = vcmask 261120   ;;  %vm19_vm1 = vcmask 0   ;;  %v708_v3 = vmov 0.0|0.0   ;;  %v709_v11 = vmov 0.0   ;;  %s879_s0 = inlined_call_operand.vmem [shape: f32[16,32], index: 0, kind: input, shape index: {}]   ;;  %s880_s1 = inlined_call_operand.vmem [shape: f32[128,32], index: 1, kind: input, shape index: {}]   ;;  %s881_s2 = inlined_call_operand.hbm [shape: f32[1,1], index: 2, kind: output, shape index: {}]  }
   0x1   :  { %v29_v0 = vld [vmem:[%s880_s1] sm:$0xff]  ;;  %v30_v1 = vld [vmem:[%s880_s1 + $0x8] sm:$0xff]  ;;  %v31_v2 = vld [vmem:[%s880_s1 + $0x10] sm:$0xff]  ;;  %588 = vmatprep.subr.bf16.mxu0 %v708_v3  ;;  %20 = vst.msk [vmem:[#allocation4] sm:$0x1] %vm19_vm1, %v709_v11 }
   0x2   :  { %v54_v4 = vmul.f32 %v29_v0, %v29_v0  ;;  %v55_v5 = vmul.f32 %v30_v1, %v30_v1  ;;  %vm741_vm2 = vmpackc.low %vm47_vm0, %vm47_vm0  ;;  %v620_v7 = vpack.c.bf16 %v30_v1, %v29_v0  ;;  %v32_v8 = vld [vmem:[%s880_s1 + $0x18] sm:$0xff]  ;;  %v56_v12 = vmul.f32 %v31_v2, %v31_v2  ;;  %v27_v14 = vld [vmem:[%s879_s0] sm:$0xff] }
   0x3   :  { %v626_v9 = vpack.c.bf16 %v32_v8, %v31_v2  ;;  %v57_v13 = vmul.f32 %v32_v8, %v32_v8  ;;  %v33_v15 = vld [vmem:[%s880_s1 + $0x20] sm:$0xff]  ;;  %v34_v16 = vld [vmem:[%s880_s1 + $0x28] sm:$0xff] }
   0x4   :  { %622 = vmatprep.subr.msk.bf16.mxu1 %vm741_vm2, %v620_v7  ;;  %v589_v10 = vpack.c.bf16 %v55_v5, %v54_v4 }
   0x5   :  { %625 = vmatpush3.bf16.xpose.msk.msra.mxu1 %vm741_vm2, %v620_v7 }
   0x6   :  { %591 = vmatpush3.bf16.xpose.msk.msra.mxu0 %vm741_vm2, %v589_v10  ;;  %628 = vmatprep.subr.msk.bf16.mxu1 %vm741_vm2, %v626_v9 }
   0x7   :  { %592 = vmatprep.subr.bf16.mxu0 %v708_v3 }
   0x8   :  { %7 = vsyncpa [#allocation6], 0  ;;  %vm710_vm3 = vmmov 0   ;;  %585 = vmatprep.mubr.msk.f32.mxu1 %vm47_vm0, %v27_v14  ;;  %v771_v17 = vld [vmem:[%s879_s0 + $0x8] sm:$0xff]  ;;  %v593_v18 = vpack.c.bf16 %v57_v13, %v56_v12  ;;  %v632_v19 = vpack.c.bf16 %v34_v16, %v33_v15  ;;  %v45_v20 = vmul.f32 %v27_v14, %v27_v14  ;;  %v35_v26 = vld [vmem:[%s880_s1 + $0x30] sm:$0xff]  ;;  %s713_s17 = smov [#allocation5]  }
   0x9   :  { %550 = vmatprep.mubr.msk.f32.mxu0 %vm710_vm3, %v709_v11  ;;  %v46_v21 = vmul.f32 %v771_v17, %v771_v17  ;;  %v58_v23 = vmul.f32 %v33_v15, %v33_v15  ;;  %v59_v24 = vmul.f32 %v34_v16, %v34_v16  ;;  %v36_v27 = vld [vmem:[%s880_s1 + $0x38] sm:$0xff]  ;;  %v60_v30 = vmul.f32 %v35_v26, %v35_v26  ;;  %v37_v32 = vld [vmem:[%s880_s1 + $0x40] sm:$0xff]  ;;  %v38_v33 = vld [vmem:[%s880_s1 + $0x48] sm:$0xff]  ;;  %s439_s18 = sshll.u32 %s713_s17, 4  ;;  %s440_s18 = int_to_ptr.vmem [resolvable:$true] %s439_s18 }
   0xa   :  { %v48_v22 = vsel %vm47_vm0, %v45_v20, 0.0  ;;  %v638_v29 = vpack.c.bf16 %v36_v27, %v35_v26  ;;  %v61_v31 = vmul.f32 %v36_v27, %v36_v27  ;;  %v644_v35 = vpack.c.bf16 %v38_v33, %v37_v32  ;;  %v39_v38 = vld [vmem:[%s880_s1 + $0x50] sm:$0xff]  ;;  %v40_v39 = vld [vmem:[%s880_s1 + $0x58] sm:$0xff]  ;;  %v41_v44 = vld [vmem:[%s880_s1 + $0x60] sm:$0xff]  ;;  %s684_s19 = scalar_lea.vmem %s440_s18, 16  ;;  %s688_s20 = scalar_lea.vmem %s440_s18, 32 }
   0xb   :  { %49 = vadd.xlane.f32.xlu0 %v48_v22  ;;  %v51_v25 = vsel %vm47_vm0, %v46_v21, 0.0  ;;  %v597_v28 = vpack.c.bf16 %v59_v24, %v58_v23  ;;  %v62_v36 = vmul.f32 %v37_v32, %v37_v32  ;;  %v63_v37 = vmul.f32 %v38_v33, %v38_v33  ;;  %v42_v45 = vld [vmem:[%s880_s1 + $0x68] sm:$0xff]  ;;  %v43_v50 = vld [vmem:[%s880_s1 + $0x70] sm:$0xff]  ;;  %v44_v51 = vld [vmem:[%s880_s1 + $0x78] sm:$0xff]  ;;  %p685_p0 = scmp.ne.s32.totalorder %s440_s18, %s684_s19  ;;  %p689_p1 = scmp.lt.s32.totalorder %s440_s18, %s440_s18 }
   0xc   :  { %v601_v34 = vpack.c.bf16 %v61_v31, %v60_v30  ;;  %v650_v41 = vpack.c.bf16 %v40_v39, %v39_v38  ;;  %v64_v42 = vmul.f32 %v39_v38, %v39_v38  ;;  %v65_v43 = vmul.f32 %v40_v39, %v40_v39  ;;  %p690_p2 = scmp.lt.s32.totalorder %s688_s20, %s684_s19 }
   0xd   :  { %631 = vmatpush3.bf16.xpose.msk.msra.mxu1 %vm741_vm2, %v626_v9  ;;  %v605_v40 = vpack.c.bf16 %v63_v37, %v62_v36  ;;  %v656_v47 = vpack.c.bf16 %v42_v45, %v41_v44  ;;  %v66_v48 = vmul.f32 %v41_v44, %v41_v44  ;;  %v67_v49 = vmul.f32 %v42_v45, %v42_v45 }
   0xe   :  { %595 = vmatpush3.bf16.xpose.msk.msra.mxu0 %vm741_vm2, %v593_v18  ;;  %634 = vmatprep.subr.msk.bf16.mxu1 %vm741_vm2, %v632_v19  ;;  %v609_v46 = vpack.c.bf16 %v65_v43, %v64_v42  ;;  %v662_v53 = vpack.c.bf16 %v44_v51, %v43_v50  ;;  %v68_v54 = vmul.f32 %v43_v50, %v43_v50  ;;  %v711_v57 = vmov 1.0   ;;  %p691_p3 = por %p690_p2, %p689_p1 }
   0xf   :  { %596 = vmatprep.subr.bf16.mxu0 %v708_v3  ;;  %52 = vadd.xlane.f32.xlu0 %v51_v25  ;;  %v613_v52 = vpack.c.bf16 %v67_v49, %v66_v48  ;;  %v69_v55 = vmul.f32 %v44_v51, %v44_v51  ;;  %v712_v58 = vmov inf   ;;  %vm24_vm4 = vcmask 7168  }
  0x10   :  { %18 = vst [vmem:[#allocation3] sm:$0x1] %v712_v58  ;;  %25 = vst.msk [vmem:[#allocation2] sm:$0xff] %vm24_vm4, %v712_v58  ;;  %v320_v59 = vlaneseq  ;;  %vm417_vm7 = vcmask 1040384   ;;  %p692_p4 = pnand %p691_p3, %p685_p0 }
  0x11   :  { %v617_v56 = vpack.c.bf16 %v69_v55, %v68_v54  ;;  %26 = vst.msk [vmem:[#allocation2 + $0x8] sm:$0xff] %vm24_vm4, %v712_v58 }
  0x12   :  { %v321_v61 = vshrl.u32 %v320_v59, 7 }
  0x14   :  { %v322_v62 = vsub.s32 0, %v321_v61 }
  0x15   :  { %637 = vmatpush3.bf16.xpose.msk.msra.mxu1 %vm741_vm2, %v632_v19 }
  0x16   :  { %599 = vmatpush3.bf16.xpose.msk.msra.mxu0 %vm741_vm2, %v597_v28  ;;  %640 = vmatprep.subr.msk.bf16.mxu1 %vm741_vm2, %v638_v29 }
  0x17   :  { %600 = vmatprep.subr.bf16.mxu0 %v708_v3  ;;  %v361_v20 = vld [vmem:[#allocation3] sm:$0x1]  ;;  %v340_v32 = vld [vmem:[#allocation2] sm:$0xff] }
  0x1d   :  { %643 = vmatpush3.bf16.xpose.msk.msra.mxu1 %vm741_vm2, %v638_v29 }
  0x1e   :  { %603 = vmatpush3.bf16.xpose.msk.msra.mxu0 %vm741_vm2, %v601_v34  ;;  %646 = vmatprep.subr.msk.bf16.mxu1 %vm741_vm2, %v644_v35 }
  0x1f   :  { %604 = vmatprep.subr.bf16.mxu0 %v708_v3 }
  0x25   :  { %649 = vmatpush3.bf16.xpose.msk.msra.mxu1 %vm741_vm2, %v644_v35  ;;  %v341_v35 = vld [vmem:[#allocation2 + $0x8] sm:$0xff] }
  0x26   :  { %607 = vmatpush3.bf16.xpose.msk.msra.mxu0 %vm741_vm2, %v605_v40  ;;  %652 = vmatprep.subr.msk.bf16.mxu1 %vm741_vm2, %v650_v41 }
  0x27   :  { %608 = vmatprep.subr.bf16.mxu0 %v708_v3 }
  0x2d   :  { %655 = vmatpush3.bf16.xpose.msk.msra.mxu1 %vm741_vm2, %v650_v41 }
  0x2e   :  { %611 = vmatpush3.bf16.xpose.msk.msra.mxu0 %vm741_vm2, %v609_v46  ;;  %658 = vmatprep.subr.msk.bf16.mxu1 %vm741_vm2, %v656_v47 }
  0x2f   :  { %612 = vmatprep.subr.bf16.mxu0 %v708_v3 }
  0x35   :  { %661 = vmatpush3.bf16.xpose.msk.msra.mxu1 %vm741_vm2, %v656_v47 }
  0x36   :  { %615 = vmatpush3.bf16.xpose.msk.msra.mxu0 %vm741_vm2, %v613_v52  ;;  %664 = vmatprep.subr.msk.bf16.mxu1 %vm741_vm2, %v662_v53 }
  0x37   :  { %616 = vmatprep.subr.bf16.mxu0 %v708_v3  ;;  %v332_v3 = vand.u32 127, %v320_v59 }
  0x39   :  { %vm335_vm5 = vcmp.lt.s32.totalorder %v332_v3, 24 }
  0x3d   :  { %667 = vmatpush3.bf16.xpose.msk.msra.mxu1 %vm741_vm2, %v662_v53 }
  0x3e   :  { %619 = vmatpush3.bf16.xpose.msk.msra.mxu0 %vm741_vm2, %v617_v56 }
  0x44   :  { %586 = vmatmul.mubr.msk.f32.vlgmr.msra.gmra.mrb[0].mxu1 %vm47_vm0, %v771_v17 }
  0x45   :  { %551 = vmatmul.mubr.msk.f32.vlgmr.msra.gmra.mrb[0].mxu0 %vm47_vm0, %v711_v57 }
  0x98   :  { %v50_v60 = vpop.xlane.xlu0 %49 }
  0x9c   :  { %v53_v0 = vpop.xlane.xlu0 %52 }
 0x117   :  { %v587_v63 = vpop.f32.mrb[0].mxu1 }
 0x118   :  { %v187_v1 = vpop.f32.mrb[0].mxu0  ;;  %v311_v2 = vpop.f32.mrb[1].mxu1  ;;  %v327_v5 = vmul.f32 2.0, %v587_v63 }
 0x119   :  { %v323_v4 = vrot.slane %v187_v1, %v322_v62  ;;  %v552_v6 = vpop.f32.mrb[1].mxu0  ;;  %v326_v7 = vmul.f32 2.0, %v311_v2 }
 0x11b   :  { %v324_v8 = vadd.f32 %v323_v4, %v50_v60  ;;  %v325_v9 = vadd.f32 %v323_v4, %v53_v0 }
 0x11d   :  { %v328_v10 = vsub.f32 %v324_v8, %v326_v7  ;;  %v329_v11 = vsub.f32 %v325_v9, %v327_v5  ;;  %v385_v5 = vld [vmem:[#allocation4] sm:$0x1] }
 0x11f   :  { %v338_v12 = vsel %vm335_vm5, %v328_v10, inf  ;;  %v351_v13 = vmin.f32 %v328_v10, %v329_v11  ;;  %v339_v15 = vsel %vm335_vm5, %v329_v11, inf }
 0x120   :  { %342 = vmin.xlane.f32.xlu1 %v338_v12 }
 0x121   :  { %v352_v14 = vrot.slane %v351_v13, 4 }
 0x123   :  { %v353_v16 = vmin.f32 %v351_v13, %v352_v14 }
 0x124   :  { %344 = vmin.xlane.f32.xlu1 %v339_v15 }
 0x125   :  { %v354_v17 = vrot.slane %v353_v16, 2 }
 0x127   :  { %v355_v18 = vmin.f32 %v353_v16, %v354_v17 }
 0x129   :  { %v356_v19 = vrot.slane %v355_v18, 1 }
 0x12b   :  { %v357_v21 = vmin.f32 %v355_v18, %v356_v19 }
 0x12d   :  { %v362_v22 = vmin.f32 %v361_v20, %v357_v21 }
 0x12f   :  { %363 = vst [vmem:[#allocation3] sm:$0x1] %v362_v22 }
 0x136   :  { %v405_v23 = vld [vmem:[#allocation3] sm:$0x1] }
 0x137   :  { %v407_v24 = vsel %vm335_vm5, %v405_v23, 0.0 }
 0x138   :  { %v408_v25 = vmax.f32 %v407_v24, 0.0 }
 0x13a   :  { %678 = vrsqrt.f32 %v408_v25  ;;  %vm411_vm6 = vcmp.eq.f32.partialorder %v408_v25, inf  ;;  %v414_v28 = vand.u32 2147483648, %v408_v25  ;;  %vm413_vm8 = vcmp.eq.f32.partialorder %v408_v25, 0.0 }
 0x144   :  { %v679_v26 = vpop.eup %678 }
 0x145   :  { %v410_v27 = vmul.f32 %v679_v26, %v408_v25 }
 0x147   :  { %v412_v29 = vsel %vm411_vm6, %v408_v25, %v410_v27 }
 0x148   :  { %v415_v30 = vsel %vm413_vm8, %v414_v28, %v412_v29 }
 0x149   :  { %v418_v31 = vsel %vm417_vm7, %v415_v30, 0.0 }
 0x14a   :  { %419 = vadd.xlane.f32.xlu1 %v418_v31 }
 0x1ad   :  { %v343_v33 = vpop.xlane.xlu1 %342 }
 0x1ae   :  { %v346_v34 = vmin.f32 %v340_v32, %v343_v33 }
 0x1b0   :  { %349 = vst.msk [vmem:[#allocation2] sm:$0xff] %vm24_vm4, %v346_v34 }
 0x1b1   :  { %v345_v36 = vpop.xlane.xlu1 %344 }
 0x1b2   :  { %v347_v37 = vmin.f32 %v341_v35, %v345_v36 }
 0x1b4   :  { %350 = vst.msk [vmem:[#allocation2 + $0x8] sm:$0xff] %vm24_vm4, %v347_v37 }
 0x1b7   :  { %v367_v38 = vld [vmem:[#allocation2] sm:$0xff] }
 0x1b8   :  { %v369_v39 = vmax.f32 %v367_v38, 0.0 }
 0x1ba   :  { %680 = vrsqrt.f32 %v369_v39  ;;  %vm373_vm9 = vcmp.eq.f32.partialorder %v369_v39, inf  ;;  %v376_v46 = vand.u32 2147483648, %v369_v39  ;;  %vm375_vm10 = vcmp.eq.f32.partialorder %v369_v39, 0.0 }
 0x1bb   :  { %v368_v40 = vld [vmem:[#allocation2 + $0x8] sm:$0xff] }
 0x1bc   :  { %v370_v41 = vmax.f32 %v368_v40, 0.0 }
 0x1be   :  { %682 = vrsqrt.f32 %v370_v41  ;;  %vm380_vm11 = vcmp.eq.f32.partialorder %v370_v41, inf  ;;  %v383_v49 = vand.u32 2147483648, %v370_v41  ;;  %vm382_vm12 = vcmp.eq.f32.partialorder %v370_v41, 0.0 }
 0x1c4   :  { %v681_v42 = vpop.eup %680 }
 0x1c5   :  { %v372_v43 = vmul.f32 %v681_v42, %v369_v39 }
 0x1c7   :  { %v374_v44 = vsel %vm373_vm9, %v369_v39, %v372_v43 }
 0x1c8   :  { %v683_v45 = vpop.eup %682  ;;  %v377_v48 = vsel %vm375_vm10, %v376_v46, %v374_v44 }
 0x1c9   :  { %v379_v47 = vmul.f32 %v683_v45, %v370_v41  ;;  %v386_v52 = vsel %vm24_vm4, %v377_v48, 0.0 }
 0x1cb   :  { %v381_v50 = vsel %vm380_vm11, %v370_v41, %v379_v47 }
 0x1cc   :  { %v384_v51 = vsel %vm382_vm12, %v383_v49, %v381_v50 }
 0x1cd   :  { %v387_v53 = vsel %vm24_vm4, %v384_v51, 0.0 }
 0x1ce   :  { %v388_v54 = vadd.f32 %v387_v53, %v386_v52 }
 0x1d0   :  { %389 = vadd.xlane.f32.xlu0 %v388_v54 }
 0x1d7   :  { %v420_v55 = vpop.xlane.xlu1 %419 }
 0x1d8   :  { %v421_v56 = vrot.slane %v420_v55, 4 }
 0x1da   :  { %v422_v57 = vadd.f32 %v421_v56, %v420_v55 }
 0x1dc   :  { %v423_v58 = vrot.slane %v422_v57, 2 }
 0x1de   :  { %v424_v62 = vadd.f32 %v423_v58, %v422_v57 }
 0x1e0   :  { %v425_v1 = vrot.slane %v424_v62, 1 }
 0x1e2   :  { %v426_v4 = vadd.f32 %v425_v1, %v424_v62 }
 0x25d   :  { %v390_v59 = vpop.xlane.xlu0 %389 }
 0x25e   :  { %v391_v60 = vrot.slane %v390_v59, 4 }
 0x260   :  { %v392_v61 = vadd.f32 %v391_v60, %v390_v59 }
 0x262   :  { %v393_v63 = vrot.slane %v392_v61, 2 }
 0x264   :  { %v394_v0 = vadd.f32 %v393_v63, %v392_v61 }
 0x266   :  { %v395_v2 = vrot.slane %v394_v0, 1 }
 0x268   :  { %v396_v3 = vadd.f32 %v395_v2, %v394_v0 }
 0x26a   :  { %668 = vpush %v396_v3 }
 0x26b   :  { %670 = vpush %v426_v4 }
 0x29b   :  { %s669_s1 = spop %668 }
 0x29c   :  { %v398_v6 = vstv %s669_s1  ;;  %s671_s16 = spop %670 }
 0x29d   :  { %v399_v7 = vmul.f32 0.0625, %v398_v6  ;;  %v428_v9 = vstv %s671_s16 }
 0x29e   :  { %v429_v10 = vmul.f32 0.041666668, %v428_v9 }
 0x29f   :  { %v400_v8 = vadd.f32 %v399_v7, %v385_v5 }
 0x2a1   :  { %402 = vst.msk [vmem:[#allocation4] sm:$0x1] %vm19_vm1, %v400_v8 }
 0x2a8   :  { %v416_v11 = vld [vmem:[#allocation4] sm:$0x1] }
 0x2a9   :  { %v430_v12 = vadd.f32 %v429_v10, %v416_v11 }
 0x2ab   :  { %432 = vst.msk [vmem:[#allocation5] sm:$0x1] %vm19_vm1, %v430_v12 }
 0x2ac   :  { %695 = shalt.err (!%p692_p4)
}
 0x2ad   :  { %s696_s23 = scalar_lea.hbm %s881_s2, 16 }
 0x2ae   :  { %p697_p5 = scmp.ne.s32.totalorder %s881_s2, %s696_s23  ;;  %p700_p6 = scmp.lt.u32.totalorder %s696_s23, %s881_s2 }
 0x2b0   :  { %p702_p7 = pnand %p700_p6, %p697_p5 }
 0x2b2   :  { %705 = shalt.err (!%p702_p7)
}
 0x2b3   :  { %442 = dma.vmem_to_hbm [thread:$0]  %s440_s18, 16, %s881_s2, [#allocation6]  }
 0x2b4   :  { %706 = dma.done.wait [#allocation6], 16  }
 0x2b5   :  { %707 = vsyncadd [#allocation6], 4294967280 }
 0x2b6   :  { %446 = vsyncpa [#allocation6], 1 }

</bundles_post_ra>
